<compile_context>
chip_gen: v5e
topology: v5e:2x2
jax: 0.10.0
libtpu: 0.0.40
codegen_flags: <defaults>
</compile_context>

<pallas_src>
import functools

import jax
import jax.numpy as jnp
from jax.experimental import pallas as pl
from jax.experimental.pallas import tpu as pltpu


def _ce_neg_kernel(logits_ref, labels_ref, redlist_ref, out_ref,
                   m_acc, l_acc, sel_acc, *, temp, n_cls, tc, mask_lanes):
    """Grid = (row_tiles, class_chunks). One step sees a (tn, tc) logits tile.

    Per-row running state (VMEM scratch, (tn, 1) f32), reset at class chunk 0:
      m_acc   running max over classes
      l_acc   running sum of exp(x - m_acc)
      sel_acc running  temp * x[redlist] - x[label]   (fused target gather)
    On the last class chunk the per-row losses for this row tile are written
    to the (1, tn, 1) output block.
    """
    ci = pl.program_id(1)

    @pl.when(ci == 0)
    def _init():
        m_acc[...] = jnp.full_like(m_acc, -jnp.inf)
        l_acc[...] = jnp.zeros_like(l_acc)
        sel_acc[...] = jnp.zeros_like(sel_acc)

    x = logits_ref[...].astype(jnp.float32)              # (tn, tc)
    lab = labels_ref[...]                                 # (tn, 1) int32
    red = redlist_ref[...]                                 # (tn, 1) int32

    # Global class index of every lane in this chunk.
    col = ci * tc + jax.lax.broadcasted_iota(jnp.int32, x.shape, 1)

    if mask_lanes:                     # ragged C: only compiled in when needed
        col_ok = col < n_cls
        x_sel = jnp.where(col_ok, x, 0.0)
        x_lse = jnp.where(col_ok, x, -jnp.inf)
    else:
        x_sel = x
        x_lse = x

    # Fused target gather: sel += sum_lanes x * (temp*1[col==red] - 1[col==lab])
    # NOTE(TODO(synk)): out-of-range labels/redlist (<0 or >=C) silently select
    # 0 (loss degenerates to logsumexp), unlike torch.gather which errors.
    w = jnp.where(col == red, temp, 0.0) - jnp.where(col == lab, 1.0, 0.0)
    sel_acc[...] += jnp.sum(x_sel * w, axis=-1, keepdims=True)

    # Online (flash-style) logsumexp across class chunks.
    m_prev = m_acc[...]
    m_new = jnp.maximum(m_prev, jnp.max(x_lse, axis=-1, keepdims=True))
    l_acc[...] = (l_acc[...] * jnp.exp(m_prev - m_new)
                  + jnp.sum(jnp.exp(x_lse - m_new), axis=-1, keepdims=True))
    m_acc[...] = m_new

    @pl.when(ci == pl.num_programs(1) - 1)
    def _finalize():
        lse = m_acc[...] + jnp.log(l_acc[...])                       # (tn, 1)
        per_row = (1.0 - temp) * lse + sel_acc[...]                  # (tn, 1)
        out_ref[...] = per_row.reshape(out_ref.shape)                # (1,tn,1)


def _vmem_plan():
    """(f32-equivalent bytes per logits tile, vmem_limit_bytes) per generation."""
    cap = 64 * 1024 * 1024           # conservative fallback (v7x per-core VMEM)
    try:
        cap = int(getattr(pltpu.get_tpu_info(), "vmem_capacity_bytes", cap)) or cap
    except Exception:
        pass
    # The kernel body materializes several (tn, tc) f32 temporaries and Pallas
    # double-buffers the logits tile, so keep the per-tile budget well under cap.
    tile_f32_bytes = min(4 * 1024 * 1024, cap // 16)
    vmem_limit = min((cap * 3) // 4, 100 * 1024 * 1024)
    return tile_f32_bytes, vmem_limit


def _choose_tiles(n_rows, n_cls, tile_f32_bytes):
    # Class chunk: keep full class axis when small, else 128-lane multiples.
    tc = n_cls if n_cls <= 4096 else 4096
    # Row tile sized so one f32 logits tile ~= tile_f32_bytes.
    tn = (tile_f32_bytes // 4) // max(1, tc)
    tn = max(16, (tn // 16) * 16)    # sublane alignment (f32: 8, bf16: 16)
    tn = min(tn, 16384)              # keep iota / where intermediates sane
    if tn >= n_rows:
        tn = n_rows
    return tn, tc


def ce_negative_loss(logits, labels, redlist, temp, reduction="mean",
                     *, tile_rows=None, tile_classes=None):
    """JAX wrapper matching CE_NegativeLoss.forward(logits, labels, redlist)."""
    if reduction not in ("mean", "sum", "none"):
        raise ValueError(f"unknown reduction {reduction!r}")

    N, C = logits.shape
    labels2 = labels.astype(jnp.int32).reshape(N, 1)
    redlist2 = redlist.astype(jnp.int32).reshape(N, 1)

    tile_f32_bytes, vmem_limit = _vmem_plan()
    tn, tc = _choose_tiles(N, C, tile_f32_bytes)
    if tile_rows is not None:
        tn = int(tile_rows)
        tn = N if tn >= N else max(8, (tn // 8) * 8)       # sublane-legal
    if tile_classes is not None:
        tc = int(tile_classes)
        tc = C if tc >= C else max(128, (tc // 128) * 128)  # lane-legal

    g_rows = pl.cdiv(N, tn)
    g_cls = pl.cdiv(C, tc)
    mask_lanes = (C % tc) != 0

    kernel = functools.partial(
        _ce_neg_kernel, temp=float(temp), n_cls=C, tc=tc, mask_lanes=mask_lanes)

    per_row_blocks = pl.pallas_call(
        kernel,
        out_shape=jax.ShapeDtypeStruct((g_rows, tn, 1), jnp.float32),
        grid_spec=pltpu.PrefetchScalarGridSpec(
            num_scalar_prefetch=0,
            grid=(g_rows, g_cls),
            in_specs=[
                pl.BlockSpec((tn, tc), lambda ri, ci: (ri, ci)),   # logits tile
                pl.BlockSpec((tn, 1), lambda ri, ci: (ri, 0)),     # labels
                pl.BlockSpec((tn, 1), lambda ri, ci: (ri, 0)),     # redlist
            ],
            out_specs=pl.BlockSpec((1, tn, 1), lambda ri, ci: (ri, 0, 0)),
            scratch_shapes=[
                pltpu.VMEM((tn, 1), jnp.float32),   # running max
                pltpu.VMEM((tn, 1), jnp.float32),   # running exp-sum
                pltpu.VMEM((tn, 1), jnp.float32),   # fused target selection
            ],
        ),
        compiler_params=pltpu.CompilerParams(
            dimension_semantics=("parallel", "arbitrary"),
            vmem_limit_bytes=int(vmem_limit),
        ),
    )(logits, labels2, redlist2)

    per_row = per_row_blocks.reshape(g_rows * tn)[:N]   # drop ragged-N padding
    if reduction == "none":
        return per_row
    total = jnp.sum(per_row)
    if reduction == "mean":
        total = total / jnp.float32(N)
    return total


def _reference(logits, labels, redlist, temp, reduction="mean"):
    logp = jax.nn.log_softmax(logits.astype(jnp.float32), axis=-1)
    pos = -jnp.take_along_axis(logp, labels[:, None], axis=-1)[:, 0]
    neg = -jnp.take_along_axis(logp, redlist[:, None], axis=-1)[:, 0]
    if reduction == "none":
        return pos - temp * neg
    if reduction == "mean":
        pos, neg = jnp.mean(pos), jnp.mean(neg)
    else:
        pos, neg = jnp.sum(pos), jnp.sum(neg)
    return pos - temp * neg


if __name__ == "__main__":
    key = jax.random.PRNGKey(0)
    k1, k2, k3, k4, k5, k6 = jax.random.split(key, 6)

    # Small case consistent with the module: batch of 16 samples, 32 classes.
    N, C, temp = 16, 32, 0.5
    logits = jax.random.normal(k1, (N, C), dtype=jnp.float32)
    labels = jax.random.randint(k2, (N,), 0, C, dtype=jnp.int32)
    redlist = jax.random.randint(k3, (N,), 0, C, dtype=jnp.int32)

    loss = jax.block_until_ready(
        ce_negative_loss(logits, labels, redlist, temp, reduction="mean"))
    ref = _reference(logits, labels, redlist, temp, reduction="mean")
    assert jnp.allclose(loss, ref, atol=1e-5, rtol=1e-5), (loss, ref)

    # Ragged shapes + forced class chunking: exercises the online-logsumexp,
    # lane-mask and ragged-row paths that large-vocab inputs hit.
    N2, C2 = 20, 300
    logits2 = jax.random.normal(k4, (N2, C2), dtype=jnp.float32)
    labels2 = jax.random.randint(k5, (N2,), 0, C2, dtype=jnp.int32)
    redlist2 = jax.random.randint(k6, (N2,), 0, C2, dtype=jnp.int32)

    loss2 = jax.block_until_ready(
        ce_negative_loss(logits2, labels2, redlist2, temp, reduction="sum",
                         tile_rows=8, tile_classes=128))
    ref2 = _reference(logits2, labels2, redlist2, temp, reduction="sum")
    assert jnp.allclose(loss2, ref2, atol=1e-4, rtol=1e-5), (loss2, ref2)

    # Per-sample (reduction='none') path.
    loss3 = jax.block_until_ready(
        ce_negative_loss(logits2, labels2, redlist2, temp, reduction="none",
                         tile_rows=8, tile_classes=128))
    ref3 = _reference(logits2, labels2, redlist2, temp, reduction="none")
    assert jnp.allclose(loss3, ref3, atol=1e-5, rtol=1e-5), (loss3, ref3)

    print("KERNEL_OK")
</pallas_src>

<mosaic_0001>
module attributes {stable_mosaic.version = 11 : i64} {
  func.func @_ce_neg_kernel(%arg0: i32, %arg1: i32, %arg2: memref<16x32xf32, #tpu.memory_space<vmem>>, %arg3: memref<16x1xi32, #tpu.memory_space<vmem>>, %arg4: memref<16x1xi32, #tpu.memory_space<vmem>>, %arg5: memref<1x16x1xf32, #tpu.memory_space<vmem>>, %arg6: memref<16x1xf32, #tpu.memory_space<vmem>>, %arg7: memref<16x1xf32, #tpu.memory_space<vmem>>, %arg8: memref<16x1xf32, #tpu.memory_space<vmem>>) attributes {dimension_semantics = [#tpu.dimension_semantics<parallel>, #tpu.dimension_semantics<arbitrary>], iteration_bounds = array<i64: 1, 1>, scalar_prefetch = 0 : i64, scratch_operands = 3 : i64, tpu.core_type = #tpu.core_type<tc>, window_params = [{transform_indices = @transform_0, window_bounds = array<i64: 16, 32>}, {transform_indices = @transform_1, window_bounds = array<i64: 16, 1>}, {transform_indices = @transform_2, window_bounds = array<i64: 16, 1>}, {transform_indices = @transform_3, window_bounds = array<i64: 1, 16, 1>}]} {
    %c0_i32 = arith.constant 0 : i32
    %0 = arith.cmpi eq, %arg1, %c0_i32 : i32
    %1 = arith.extui %0 : i1 to i32
    %c0_i32_0 = arith.constant 0 : i32
    %2 = arith.cmpi ne, %1, %c0_i32_0 : i32
    scf.if %2 {
      %cst_26 = arith.constant 0xFF800000 : f32
      %46 = vector.broadcast %cst_26 : f32 to vector<16x1xf32>
      %c0_27 = arith.constant 0 : index
      %c0_28 = arith.constant 0 : index
      %47 = vector.load %arg6[%c0_27, %c0_28] : memref<16x1xf32, #tpu.memory_space<vmem>>, vector<16x1xf32>
      tpu.vector_store %arg6[%c0_27, %c0_28], %46 {strides = array<i32>} : memref<16x1xf32, #tpu.memory_space<vmem>>, vector<16x1xf32>,
      %cst_29 = arith.constant 0.000000e+00 : f32
      %48 = vector.broadcast %cst_29 : f32 to vector<16x1xf32>
      %c0_30 = arith.constant 0 : index
      %c0_31 = arith.constant 0 : index
      %49 = vector.load %arg7[%c0_30, %c0_31] : memref<16x1xf32, #tpu.memory_space<vmem>>, vector<16x1xf32>
      tpu.vector_store %arg7[%c0_30, %c0_31], %48 {strides = array<i32>} : memref<16x1xf32, #tpu.memory_space<vmem>>, vector<16x1xf32>,
      %cst_32 = arith.constant 0.000000e+00 : f32
      %50 = vector.broadcast %cst_32 : f32 to vector<16x1xf32>
      %c0_33 = arith.constant 0 : index
      %c0_34 = arith.constant 0 : index
      %51 = vector.load %arg8[%c0_33, %c0_34] : memref<16x1xf32, #tpu.memory_space<vmem>>, vector<16x1xf32>
      tpu.vector_store %arg8[%c0_33, %c0_34], %50 {strides = array<i32>} : memref<16x1xf32, #tpu.memory_space<vmem>>, vector<16x1xf32>,
    } else {
    }
    %c0 = arith.constant 0 : index
    %c0_1 = arith.constant 0 : index
    %3 = vector.load %arg2[%c0, %c0_1] : memref<16x32xf32, #tpu.memory_space<vmem>>, vector<16x32xf32>
    %c0_2 = arith.constant 0 : index
    %c0_3 = arith.constant 0 : index
    %4 = vector.load %arg3[%c0_2, %c0_3] : memref<16x1xi32, #tpu.memory_space<vmem>>, vector<16x1xi32>
    %c0_4 = arith.constant 0 : index
    %c0_5 = arith.constant 0 : index
    %5 = vector.load %arg4[%c0_4, %c0_5] : memref<16x1xi32, #tpu.memory_space<vmem>>, vector<16x1xi32>
    %c32_i32 = arith.constant 32 : i32
    %6 = arith.muli %arg1, %c32_i32 : i32
    %7 = tpu.iota {dimensions = array<i32: 1>} : vector<16x32xi32>
    %8 = vector.broadcast %6 : i32 to vector<16x32xi32>
    %9 = arith.addi %8, %7 : vector<16x32xi32>
    %10 = vector.broadcast %5 : vector<16x1xi32> to vector<16x32xi32>
    %11 = arith.cmpi eq, %9, %10 : vector<16x32xi32>
    %cst = arith.constant 5.000000e-01 : f32
    %cst_6 = arith.constant 0.000000e+00 : f32
    %12 = vector.broadcast %cst : f32 to vector<16x32xf32>
    %13 = vector.broadcast %cst_6 : f32 to vector<16x32xf32>
    %14 = arith.select %11, %12, %13 : vector<16x32xi1>, vector<16x32xf32>
    %15 = vector.broadcast %4 : vector<16x1xi32> to vector<16x32xi32>
    %16 = arith.cmpi eq, %9, %15 : vector<16x32xi32>
    %cst_7 = arith.constant 1.000000e+00 : f32
    %cst_8 = arith.constant 0.000000e+00 : f32
    %17 = vector.broadcast %cst_7 : f32 to vector<16x32xf32>
    %18 = vector.broadcast %cst_8 : f32 to vector<16x32xf32>
    %19 = arith.select %16, %17, %18 : vector<16x32xi1>, vector<16x32xf32>
    %20 = arith.subf %14, %19 : vector<16x32xf32>
    %c0_9 = arith.constant 0 : index
    %c0_10 = arith.constant 0 : index
    %21 = vector.load %arg8[%c0_9, %c0_10] : memref<16x1xf32, #tpu.memory_space<vmem>>, vector<16x1xf32>
    %22 = arith.mulf %3, %20 : vector<16x32xf32>
    %cst_11 = arith.constant dense<0.000000e+00> : vector<16xf32>
    %23 = vector.multi_reduction <add>, %22, %cst_11 [1] : vector<16x32xf32> to vector<16xf32>
    %24 = vector.shape_cast %23 : vector<16xf32> to vector<16x1xf32>
    %25 = arith.addf %21, %24 : vector<16x1xf32>
    %c0_12 = arith.constant 0 : index
    %c0_13 = arith.constant 0 : index
    %26 = vector.load %arg8[%c0_12, %c0_13] : memref<16x1xf32, #tpu.memory_space<vmem>>, vector<16x1xf32>
    tpu.vector_store %arg8[%c0_12, %c0_13], %25 {strides = array<i32>} : memref<16x1xf32, #tpu.memory_space<vmem>>, vector<16x1xf32>,
    %c0_14 = arith.constant 0 : index
    %c0_15 = arith.constant 0 : index
    %27 = vector.load %arg6[%c0_14, %c0_15] : memref<16x1xf32, #tpu.memory_space<vmem>>, vector<16x1xf32>
    %cst_16 = arith.constant dense<0xFF800000> : vector<16xf32>
    %28 = vector.multi_reduction <maximumf>, %3, %cst_16 [1] : vector<16x32xf32> to vector<16xf32>
    %29 = vector.shape_cast %28 : vector<16xf32> to vector<16x1xf32>
    %30 = arith.maximumf %27, %29 : vector<16x1xf32>
    %c0_17 = arith.constant 0 : index
    %c0_18 = arith.constant 0 : index
    %31 = vector.load %arg7[%c0_17, %c0_18] : memref<16x1xf32, #tpu.memory_space<vmem>>, vector<16x1xf32>
    %32 = arith.subf %27, %30 : vector<16x1xf32>
    %33 = math.exp %32 : vector<16x1xf32>
    %34 = arith.mulf %31, %33 : vector<16x1xf32>
    %35 = vector.broadcast %30 : vector<16x1xf32> to vector<16x32xf32>
    %36 = arith.subf %3, %35 : vector<16x32xf32>
    %37 = math.exp %36 : vector<16x32xf32>
    %cst_19 = arith.constant dense<0.000000e+00> : vector<16xf32>
    %38 = vector.multi_reduction <add>, %37, %cst_19 [1] : vector<16x32xf32> to vector<16xf32>
    %39 = vector.shape_cast %38 : vector<16xf32> to vector<16x1xf32>
    %40 = arith.addf %34, %39 : vector<16x1xf32>
    %c0_20 = arith.constant 0 : index
    %c0_21 = arith.constant 0 : index
    %41 = vector.load %arg7[%c0_20, %c0_21] : memref<16x1xf32, #tpu.memory_space<vmem>>, vector<16x1xf32>
    tpu.vector_store %arg7[%c0_20, %c0_21], %40 {strides = array<i32>} : memref<16x1xf32, #tpu.memory_space<vmem>>, vector<16x1xf32>,
    %c0_22 = arith.constant 0 : index
    %c0_23 = arith.constant 0 : index
    %42 = vector.load %arg6[%c0_22, %c0_23] : memref<16x1xf32, #tpu.memory_space<vmem>>, vector<16x1xf32>
    tpu.vector_store %arg6[%c0_22, %c0_23], %30 {strides = array<i32>} : memref<16x1xf32, #tpu.memory_space<vmem>>, vector<16x1xf32>,
    %c0_i32_24 = arith.constant 0 : i32
    %43 = arith.cmpi eq, %arg1, %c0_i32_24 : i32
    %44 = arith.extui %43 : i1 to i32
    %c0_i32_25 = arith.constant 0 : i32
    %45 = arith.cmpi ne, %44, %c0_i32_25 : i32
    scf.if %45 {
      %c0_26 = arith.constant 0 : index
      %c0_27 = arith.constant 0 : index
      %46 = vector.load %arg6[%c0_26, %c0_27] : memref<16x1xf32, #tpu.memory_space<vmem>>, vector<16x1xf32>
      %c0_28 = arith.constant 0 : index
      %c0_29 = arith.constant 0 : index
      %47 = vector.load %arg7[%c0_28, %c0_29] : memref<16x1xf32, #tpu.memory_space<vmem>>, vector<16x1xf32>
      %48 = math.log %47 : vector<16x1xf32>
      %49 = arith.addf %46, %48 : vector<16x1xf32>
      %cst_30 = arith.constant 5.000000e-01 : f32
      %50 = vector.broadcast %cst_30 : f32 to vector<16x1xf32>
      %51 = arith.mulf %50, %49 : vector<16x1xf32>
      %c0_31 = arith.constant 0 : index
      %c0_32 = arith.constant 0 : index
      %52 = vector.load %arg8[%c0_31, %c0_32] : memref<16x1xf32, #tpu.memory_space<vmem>>, vector<16x1xf32>
      %53 = arith.addf %51, %52 : vector<16x1xf32>
      %54 = vector.shape_cast %53 : vector<16x1xf32> to vector<1x16x1xf32>
      %c0_33 = arith.constant 0 : index
      %c0_34 = arith.constant 0 : index
      %c0_35 = arith.constant 0 : index
      %55 = vector.load %arg5[%c0_33, %c0_34, %c0_35] : memref<1x16x1xf32, #tpu.memory_space<vmem>>, vector<1x16x1xf32>
      tpu.vector_store %arg5[%c0_33, %c0_34, %c0_35], %54 {strides = array<i32>} : memref<1x16x1xf32, #tpu.memory_space<vmem>>, vector<1x16x1xf32>,
    } else {
    }
    return
  }
  func.func @transform_0(%arg0: i32, %arg1: i32) -> (i32, i32) {
    %c0_i32 = arith.constant 0 : i32
    return %arg0, %arg1 : i32, i32
  }
  func.func @transform_1(%arg0: i32, %arg1: i32) -> (i32, i32) {
    %c0_i32 = arith.constant 0 : i32
    %c0_i32_0 = arith.constant 0 : i32
    return %arg0, %c0_i32 : i32, i32
  }
  func.func @transform_2(%arg0: i32, %arg1: i32) -> (i32, i32) {
    %c0_i32 = arith.constant 0 : i32
    %c0_i32_0 = arith.constant 0 : i32
    return %arg0, %c0_i32 : i32, i32
  }
  func.func @transform_3(%arg0: i32, %arg1: i32) -> (i32, i32, i32) {
    %c0_i32 = arith.constant 0 : i32
    %c0_i32_0 = arith.constant 0 : i32
    %c0_i32_1 = arith.constant 0 : i32
    return %arg0, %c0_i32, %c0_i32_0 : i32, i32, i32
  }
}

</mosaic_0001>

<bundles_post_ra>
// kernel: tpu_custom_call.1
= control target key start
LH: loop header
LB: loop body
LE: loop exit
PB: predicated region body
PF: predicated region fallthrough
CT: control target
= control target key end

     0   :  { %vm62_vm0 = vcmask 261120   ;;  %vm18_vm1 = vcmask 7168   ;;  %v165_v1 = vmov -inf   ;;  %v166_v5 = vmov 0   ;;  %s237_s0 = inlined_call_operand.vmem [shape: f32[16,32], index: 0, kind: input, shape index: {}]   ;;  %s238_s2 = inlined_call_operand.vmem [shape: s32[16,1], index: 2, kind: input, shape index: {}]   ;;  %s239_s1 = inlined_call_operand.vmem [shape: s32[16,1], index: 1, kind: input, shape index: {}]   ;;  %s240_s3 = inlined_call_operand.vmem [shape: f32[1,16,1], index: 3, kind: output, shape index: {}]  }
   0x1   :  { %v25_v0 = vld [vmem:[%s237_s0] sm:$0xff]  ;;  %19 = vst.msk [vmem:[#allocation2] sm:$0xff] %vm18_vm1, %v165_v1  ;;  %v197_v3 = vld [vmem:[%s237_s0 + $0x8] sm:$0xff]  ;;  %150 = vset.pattern.permute.xlu1 %v166_v5  ;;  %152 = vset.pattern.permute.xlu0 %v166_v5  ;;  %v167_v6 = vmov 0.0   ;;  %v32_v19 = vlaneseq }
   0x2   :  { %v76_v2 = vsel %vm62_vm0, %v25_v0, -inf  ;;  %20 = vst.msk [vmem:[#allocation2 + $0x8] sm:$0xff] %vm18_vm1, %v165_v1  ;;  %v79_v4 = vsel %vm62_vm0, %v197_v3, -inf  ;;  %151 = vset.pattern.permute.xlu2 %v166_v5  ;;  %v27_v7 = vld [vmem:[%s239_s1] sm:$0xff]  ;;  %v30_v9 = vld [vmem:[%s238_s2 + $0x8] sm:$0xff] }
   0x3   :  { %77 = vmax.xlane.f32.xlu0 %v76_v2  ;;  %21 = vst.msk [vmem:[#allocation3] sm:$0xff] %vm18_vm1, %v167_v6  ;;  %v29_v8 = vld [vmem:[%s238_s2] sm:$0xff]  ;;  %v28_v18 = vld [vmem:[%s239_s1 + $0x8] sm:$0xff]  ;;  %v33_v20 = vand.u32 127, %v32_v19 }
   0x4   :  { %22 = vst.msk [vmem:[#allocation3 + $0x8] sm:$0xff] %vm18_vm1, %v167_v6  ;;  %37 = vperm.xlu2 %151, %v29_v8  }
   0x5   :  { %23 = vst.msk [vmem:[#allocation4] sm:$0xff] %vm18_vm1, %v167_v6 }
   0x6   :  { %24 = vst.msk [vmem:[#allocation4 + $0x8] sm:$0xff] %vm18_vm1, %v167_v6 }
   0x8   :  { %v74_v10 = vld [vmem:[#allocation2] sm:$0xff] }
   0x9   :  { %v75_v14 = vld [vmem:[#allocation2 + $0x8] sm:$0xff] }
   0xa   :  { %v84_v51 = vld [vmem:[#allocation3] sm:$0xff] }
   0xb   :  { %80 = vmax.xlane.f32.xlu0 %v79_v4  ;;  %v85_v56 = vld [vmem:[#allocation3 + $0x8] sm:$0xff] }
   0xc   :  { %40 = vperm.xlu2 %151, %v30_v9   ;;  %v58_v45 = vld [vmem:[#allocation4] sm:$0xff] }
   0xd   :  { %v59_v60 = vld [vmem:[#allocation4 + $0x8] sm:$0xff] }
  0x1f   :  { %47 = vperm.xlu0 %152, %v27_v7  }
  0x5e   :  { %v38_v21 = vpop.permute.xlu2 %37 }
  0x5f   :  { %vm42_vm2 = vcmp.eq.s32.totalorder %v33_v20, %v38_v21 }
  0x60   :  { %v44_v22 = vsel %vm42_vm2, 0.5, %v167_v6 }
  0x66   :  { %v41_v33 = vpop.permute.xlu2 %40 }
  0x67   :  { %vm43_vm4 = vcmp.eq.s32.totalorder %v33_v20, %v41_v33 }
  0x68   :  { %v45_v37 = vsel %vm43_vm4, 0.5, %v167_v6 }
  0x76   :  { %v78_v11 = vpop.xlane.xlu0 %77 }
  0x77   :  { %v82_v12 = vmax.f32 %v74_v10, %v78_v11 }
  0x79   :  { %v86_v13 = vsub.f32 %v74_v10, %v82_v12  ;;  %120 = vst.msk [vmem:[#allocation2] sm:$0xff] %vm18_vm1, %v82_v12  ;;  %96 = vperm.xlu1 %150, %v82_v12  }
  0x7b   :  { %v88_v48 = vmul.f32 1.442695, %v86_v13 }
  0x7e   :  { %v81_v15 = vpop.xlane.xlu0 %80 }
  0x7f   :  { %v83_v16 = vmax.f32 %v75_v14, %v81_v15 }
  0x81   :  { %v87_v17 = vsub.f32 %v75_v14, %v83_v16  ;;  %121 = vst.msk [vmem:[#allocation2 + $0x8] sm:$0xff] %vm18_vm1, %v83_v16  ;;  %101 = vperm.xlu1 %150, %v83_v16  }
  0x83   :  { %v90_v49 = vmul.f32 1.442695, %v87_v17 }
  0x88   :  { %v126_v10 = vld [vmem:[#allocation2 + $0x8] sm:$0xff] }
  0x89   :  { %50 = vperm.xlu1 %150, %v28_v18  }
  0x91   :  { %v48_v23 = vpop.permute.xlu0 %47 }
  0x92   :  { %vm52_vm3 = vcmp.eq.s32.totalorder %v33_v20, %v48_v23 }
  0x93   :  { %v54_v24 = vsel %vm52_vm3, 1.0, %v167_v6 }
  0x94   :  { %v56_v25 = vsub.f32 %v44_v22, %v54_v24 }
  0x96   :  { %v60_v26 = vmul.f32 %v56_v25, %v25_v0 }
  0x98   :  { %v63_v27 = vsel %vm62_vm0, %v60_v26, 0.0 }
  0x99   :  { %64 = vadd.xlane.f32.xlu0 %v63_v27 }
  0xeb   :  { %v97_v28 = vpop.permute.xlu1 %96 }
  0xec   :  { %v104_v29 = vsub.f32 %v25_v0, %v97_v28 }
  0xee   :  { %v106_v30 = vmul.f32 1.442695, %v104_v29 }
  0xf0   :  { %153 = vpow2.f32 %v106_v30 }
  0xf3   :  { %v102_v31 = vpop.permute.xlu1 %101 }
  0xf4   :  { %v105_v32 = vsub.f32 %v197_v3, %v102_v31 }
  0xf6   :  { %v154_v34 = vpop.eup %153  ;;  %v108_v35 = vmul.f32 1.442695, %v105_v32 }
  0xf7   :  { %v110_v36 = vsel %vm62_vm0, %v154_v34, 0.0 }
  0xf8   :  { %155 = vpow2.f32 %v108_v35  ;;  %111 = vadd.xlane.f32.xlu2 %v110_v36 }
  0xf9   :  { %157 = vpow2.f32 %v88_v48 }
  0xfa   :  { %159 = vpow2.f32 %v90_v49 }
  0xfb   :  { %v51_v38 = vpop.permute.xlu1 %50 }
  0xfc   :  { %vm53_vm5 = vcmp.eq.s32.totalorder %v33_v20, %v51_v38 }
  0xfd   :  { %v55_v39 = vsel %vm53_vm5, 1.0, %v167_v6 }
  0xfe   :  { %v156_v40 = vpop.eup %155  ;;  %v57_v41 = vsub.f32 %v45_v37, %v55_v39 }
  0xff   :  { %v113_v42 = vsel %vm62_vm0, %v156_v40, 0.0  ;;  %v158_v50 = vpop.eup %157 }
 0x100   :  { %114 = vadd.xlane.f32.xlu1 %v113_v42  ;;  %v61_v43 = vmul.f32 %v57_v41, %v197_v3  ;;  %v92_v52 = vmul.f32 %v158_v50, %v84_v51  ;;  %v160_v55 = vpop.eup %159  ;;  %v125_v3 = vld [vmem:[#allocation2] sm:$0xff] }
 0x101   :  { %v93_v57 = vmul.f32 %v160_v55, %v85_v56 }
 0x102   :  { %v66_v44 = vsel %vm62_vm0, %v61_v43, 0.0 }
 0x103   :  { %67 = vadd.xlane.f32.xlu2 %v66_v44 }
 0x10c   :  { %v65_v46 = vpop.xlane.xlu0 %64 }
 0x10d   :  { %v69_v47 = vadd.f32 %v65_v46, %v58_v45 }
 0x10f   :  { %72 = vst.msk [vmem:[#allocation4] sm:$0xff] %vm18_vm1, %v69_v47 }
 0x116   :  { %v137_v5 = vld [vmem:[#allocation4] sm:$0xff] }
 0x16b   :  { %v112_v53 = vpop.xlane.xlu2 %111 }
 0x16c   :  { %v116_v54 = vadd.f32 %v112_v53, %v92_v52 }
 0x16e   :  { %118 = vst.msk [vmem:[#allocation3] sm:$0xff] %vm18_vm1, %v116_v54 }
 0x173   :  { %v115_v58 = vpop.xlane.xlu1 %114 }
 0x174   :  { %v117_v59 = vadd.f32 %v115_v58, %v93_v57 }
 0x175   :  { %v127_v61 = vld [vmem:[#allocation3] sm:$0xff] }
 0x176   :  { %161 = vlog2.f32 %v127_v61  ;;  %119 = vst.msk [vmem:[#allocation3 + $0x8] sm:$0xff] %vm18_vm1, %v117_v59  ;;  %v68_v62 = vpop.xlane.xlu2 %67 }
 0x177   :  { %v70_v63 = vadd.f32 %v68_v62, %v59_v60 }
 0x179   :  { %73 = vst.msk [vmem:[#allocation4 + $0x8] sm:$0xff] %vm18_vm1, %v70_v63 }
 0x17c   :  { %v162_v0 = vpop.eup %161 }
 0x17d   :  { %v130_v1 = vmul.f32 0.6931472, %v162_v0  ;;  %v128_v2 = vld [vmem:[#allocation3 + $0x8] sm:$0xff] }
 0x17e   :  { %163 = vlog2.f32 %v128_v2 }
 0x17f   :  { %v133_v4 = vadd.f32 %v130_v1, %v125_v3 }
 0x180   :  { %v138_v13 = vld [vmem:[#allocation4 + $0x8] sm:$0xff] }
 0x181   :  { %v135_v6 = vmul.f32 0.5, %v133_v4 }
 0x183   :  { %v139_v7 = vadd.f32 %v137_v5, %v135_v6 }
 0x184   :  { %v164_v8 = vpop.eup %163 }
 0x185   :  { %v132_v9 = vmul.f32 0.6931472, %v164_v8  ;;  %141 = vst.msk [vmem:[%s240_s3] sm:$0xff] %vm18_vm1, %v139_v7 }
 0x187   :  { %v134_v11 = vadd.f32 %v132_v9, %v126_v10 }
 0x189   :  { %v136_v12 = vmul.f32 0.5, %v134_v11 }
 0x18b   :  { %v140_v14 = vadd.f32 %v138_v13, %v136_v12 }
 0x18d   :  { %142 = vst.msk [vmem:[%s240_s3 + $0x8] sm:$0xff] %vm18_vm1, %v140_v14 }

</bundles_post_ra>
